<compile_context>
chip_gen: v7x
topology: tpu7x:2x2x1
jax: 0.10.0
libtpu: 0.0.40
codegen_flags: <defaults>
</compile_context>

<pallas_src>
import math
import functools

import jax
import jax.numpy as jnp
from jax.experimental import pallas as pl
from jax.experimental.pallas import tpu as pltpu


# --------------------------------------------------------------------------
# Kernels
# --------------------------------------------------------------------------
def _pe_add_kernel(x_ref, pe_ref, o_ref):
    """o = x + pe  (pe broadcast over batch)."""
    o_ref[...] = (x_ref[...] + pe_ref[...][None, :, :]).astype(o_ref.dtype)


def _pe_add_dropout_kernel(x_ref, pe_ref, bits_ref, o_ref, *, threshold, scale):
    """o = inverted_dropout(x + pe): keep iff bits >= threshold, scale kept."""
    y = x_ref[...] + pe_ref[...][None, :, :]
    keep = bits_ref[...] >= jnp.uint32(threshold)          # P(keep) = 1 - p
    o_ref[...] = jnp.where(keep, y * jnp.asarray(scale, y.dtype),
                           jnp.zeros_like(y)).astype(o_ref.dtype)


# --------------------------------------------------------------------------
# Wrapper
# --------------------------------------------------------------------------
def _build_pe_table(S, D, dtype):
    """Sinusoidal PE table, identical to the PyTorch buffer (traced once)."""
    position = jnp.arange(S, dtype=jnp.float32)[:, None]                 # (S, 1)
    div_term = jnp.exp(jnp.arange(0, D, 2, dtype=jnp.float32)
                       * (-math.log(10000.0) / D))                       # (D/2,)
    angles = position * div_term                                         # (S, D/2)
    # interleave: pe[:, 0::2] = sin, pe[:, 1::2] = cos
    pe = jnp.stack([jnp.sin(angles), jnp.cos(angles)], axis=-1).reshape(S, D)
    return pe.astype(dtype)


def _choose_tiles(B, S, D, target_bytes=2 * 1024 * 1024):
    """Pick (batch_tile, seq_tile) so one f32 block is ~target_bytes.

    seq_tile is either the full S (always a legal block extent) or 512
    (multiple of 8 -> legal sublane tiling); batch_tile grows to fill the
    byte budget.  Ragged tails are handled by pl.cdiv grids (Pallas masks
    the out-of-bounds part of the last block).
    """
    target_elems = max(1, target_bytes // 4)
    st = S if S <= 512 else 512
    bt = int(max(1, min(B, target_elems // max(st * D, 1))))
    return bt, st


def positional_encoding(x, *, dropout_p=0.1, key=None):
    """x: (batch, seq, d_model). Returns dropout(x + pe[:seq]), training mode."""
    B, S, D = x.shape
    assert D % 2 == 0, "d_model must be even (same restriction as the PyTorch module)"
    assert 0.0 <= dropout_p < 1.0
    # Perf note: D should be a multiple of 128 for lane-dense (unmasked) stores.

    pe = _build_pe_table(S, D, x.dtype)
    bt, st = _choose_tiles(B, S, D)
    grid = (pl.cdiv(B, bt), pl.cdiv(S, st))

    x_spec = pl.BlockSpec((bt, st, D), lambda b, s: (b, s, 0))
    pe_spec = pl.BlockSpec((st, D), lambda b, s: (s, 0))
    out_spec = pl.BlockSpec((bt, st, D), lambda b, s: (b, s, 0))

    compiler_params = pltpu.CompilerParams(
        dimension_semantics=("parallel", "parallel"),   # independent tiles (v7x 2-TC)
        vmem_limit_bytes=32 * 1024 * 1024,
    )
    elem_bytes = jnp.dtype(x.dtype).itemsize

    if dropout_p == 0.0:
        cost = pl.CostEstimate(
            flops=B * S * D,
            transcendentals=0,
            bytes_accessed=(2 * B * S * D + S * D) * elem_bytes,
        )
        return pl.pallas_call(
            _pe_add_kernel,
            out_shape=jax.ShapeDtypeStruct((B, S, D), x.dtype),
            grid=grid,
            in_specs=[x_spec, pe_spec],
            out_specs=out_spec,
            compiler_params=compiler_params,
            cost_estimate=cost,
        )(x, pe)

    # ---- dropout path ------------------------------------------------------
    if key is None:
        key = jax.random.PRNGKey(0)
    # uniform uint32 bits; keep decision done in the integer domain in-kernel
    bits = jax.random.bits(key, (B, S, D), dtype=jnp.uint32)
    threshold = min(int(round(dropout_p * (1 << 32))), (1 << 32) - 1)
    scale = 1.0 / (1.0 - dropout_p)

    kernel = functools.partial(_pe_add_dropout_kernel,
                               threshold=threshold, scale=scale)
    cost = pl.CostEstimate(
        flops=3 * B * S * D,
        transcendentals=0,
        bytes_accessed=(2 * B * S * D + S * D) * elem_bytes + B * S * D * 4,
    )
    return pl.pallas_call(
        kernel,
        out_shape=jax.ShapeDtypeStruct((B, S, D), x.dtype),
        grid=grid,
        in_specs=[x_spec, pe_spec,
                  pl.BlockSpec((bt, st, D), lambda b, s: (b, s, 0))],  # bits
        out_specs=out_spec,
        compiler_params=compiler_params,
        cost_estimate=cost,
    )(x, pe, bits)


# --------------------------------------------------------------------------
# Pure-JAX reference (deterministic part: PE add, no dropout)
# --------------------------------------------------------------------------
def _reference_pe(x):
    B, S, D = x.shape
    position = jnp.arange(S, dtype=jnp.float32)[:, None]
    div_term = jnp.exp(jnp.arange(0, D, 2, dtype=jnp.float32)
                       * (-math.log(10000.0) / D))
    pe = jnp.zeros((S, D), jnp.float32)
    pe = pe.at[:, 0::2].set(jnp.sin(position * div_term))
    pe = pe.at[:, 1::2].set(jnp.cos(position * div_term))
    return x + pe[None, :, :]


if __name__ == "__main__":
    key = jax.random.PRNGKey(0)
    kx, kd = jax.random.split(key)

    # Small shapes consistent with the module; d_model=128 keeps the last dim
    # lane-dense (multiple of 128) per the perf guidance.
    B, S, D = 2, 8, 128
    x = jax.random.normal(kx, (B, S, D), dtype=jnp.float32)

    # Deterministic check: dropout_p = 0 -> kernel must equal x + pe.
    y_det = jax.block_until_ready(positional_encoding(x, dropout_p=0.0))
    ref = _reference_pe(x)
    assert jnp.allclose(y_det, ref, atol=1e-5, rtol=1e-5), "PE mismatch"

    # Training-mode forward with dropout active (p = 0.1).
    y = jax.block_until_ready(positional_encoding(x, dropout_p=0.1, key=kd))
    assert y.shape == (B, S, D) and y.dtype == x.dtype
    # zeros appear only where dropped; non-dropped entries are scaled ref values
    nz = y != 0
    assert jnp.allclose(jnp.where(nz, y, 0.0),
                        jnp.where(nz, ref / (1.0 - 0.1), 0.0),
                        atol=1e-5, rtol=1e-5), "dropout scaling mismatch"

    # TODO(synk): dropout mask cannot bit-match torch.nn.Dropout's RNG stream;
    # this is an equivalent inverted-dropout implementation.
    print("KERNEL_OK")
</pallas_src>

<mosaic_0001>
module attributes {stable_mosaic.version = 11 : i64} {
  func.func @_pe_add_kernel(%arg0: i32, %arg1: i32, %arg2: memref<2x8x128xf32, #tpu.memory_space<vmem>>, %arg3: memref<8x128xf32, #tpu.memory_space<vmem>>, %arg4: memref<2x8x128xf32, #tpu.memory_space<vmem>>) attributes {dimension_semantics = [#tpu.dimension_semantics<parallel>, #tpu.dimension_semantics<parallel>], iteration_bounds = array<i64: 1, 1>, scalar_prefetch = 0 : i64, scratch_operands = 0 : i64, tpu.core_type = #tpu.core_type<tc>, window_params = [{transform_indices = @transform_0, window_bounds = array<i64: 2, 8, 128>}, {transform_indices = @transform_1, window_bounds = array<i64: 8, 128>}, {transform_indices = @transform_2, window_bounds = array<i64: 2, 8, 128>}]} {
    %c0 = arith.constant 0 : index
    %c0_0 = arith.constant 0 : index
    %c0_1 = arith.constant 0 : index
    %0 = vector.load %arg2[%c0, %c0_0, %c0_1] : memref<2x8x128xf32, #tpu.memory_space<vmem>>, vector<2x8x128xf32>
    %c0_2 = arith.constant 0 : index
    %c0_3 = arith.constant 0 : index
    %1 = vector.load %arg3[%c0_2, %c0_3] : memref<8x128xf32, #tpu.memory_space<vmem>>, vector<8x128xf32>
    %2 = vector.shape_cast %1 : vector<8x128xf32> to vector<1x8x128xf32>
    %3 = vector.broadcast %2 : vector<1x8x128xf32> to vector<2x8x128xf32>
    %4 = arith.addf %0, %3 : vector<2x8x128xf32>
    %c0_4 = arith.constant 0 : index
    %c0_5 = arith.constant 0 : index
    %c0_6 = arith.constant 0 : index
    %5 = vector.load %arg4[%c0_4, %c0_5, %c0_6] : memref<2x8x128xf32, #tpu.memory_space<vmem>>, vector<2x8x128xf32>
    tpu.vector_store %arg4[%c0_4, %c0_5, %c0_6], %4 {strides = array<i32>} : memref<2x8x128xf32, #tpu.memory_space<vmem>>, vector<2x8x128xf32>,
    return
  }
  func.func @transform_0(%arg0: i32, %arg1: i32) -> (i32, i32, i32) {
    %c0_i32 = arith.constant 0 : i32
    %c0_i32_0 = arith.constant 0 : i32
    return %arg0, %arg1, %c0_i32 : i32, i32, i32
  }
  func.func @transform_1(%arg0: i32, %arg1: i32) -> (i32, i32) {
    %c0_i32 = arith.constant 0 : i32
    %c0_i32_0 = arith.constant 0 : i32
    return %arg1, %c0_i32 : i32, i32
  }
  func.func @transform_2(%arg0: i32, %arg1: i32) -> (i32, i32, i32) {
    %c0_i32 = arith.constant 0 : i32
    %c0_i32_0 = arith.constant 0 : i32
    return %arg0, %arg1, %c0_i32 : i32, i32, i32
  }
}

</mosaic_0001>

<bundles_post_ra>
// kernel: tpu_custom_call.1
= control target key start
LH: loop header
LB: loop body
LE: loop exit
PB: predicated region body
PF: predicated region fallthrough
CT: control target
= control target key end

     0   :  { %7 = vsyncpa [#allocation3], 0  ;;  %s202_s0 = inlined_call_operand.hbm [shape: f32[2,8,128], index: 0, kind: input, shape index: {}]   ;;  %s203_s1 = inlined_call_operand.hbm [shape: f32[8,128], index: 1, kind: input, shape index: {}]   ;;  %s204_s2 = inlined_call_operand.hbm [shape: f32[2,8,128], index: 2, kind: output, shape index: {}]  }
   0x1   :  { %8 = vsyncpa [#allocation6], 0 }
   0x2   :  { %9 = vsyncpa [#allocation4], 0  ;;  %s140_s9 = smov [#allocation2]   ;;  %s68_s13 = scalar_lea.hbm %s202_s0, 256 }
   0x3   :  { %s15_s10 = sshll.u32 %s140_s9, 4  ;;  %p69_p0 = scmp.ne.s32.totalorder %s202_s0, %s68_s13  ;;  %s16_s10 = int_to_ptr.vmem [resolvable:$true] %s15_s10 }
   0x4   :  { %p72_p1 = scmp.lt.u32.totalorder %s68_s13, %s202_s0 }
   0x6   :  { %p74_p2 = pnand %p72_p1, %p69_p0 }
   0x8   :  { %77 = shalt.err (!%p74_p2)
}
   0x9   :  { %s78_s18 = scalar_lea.vmem %s16_s10, 256  ;;  %p83_p4 = scmp.lt.s32.totalorder %s16_s10, %s16_s10 }
   0xa   :  { %p79_p3 = scmp.ne.s32.totalorder %s16_s10, %s78_s18  ;;  %p84_p5 = scmp.lt.s32.totalorder %s78_s18, %s78_s18 }
   0xc   :  { %p85_p6 = por %p84_p5, %p83_p4 }
   0xe   :  { %p86_p7 = pnand %p85_p6, %p79_p3 }
  0x10   :  { %89 = shalt.err (!%p86_p7)
}
  0x11   :  { %s141_s19 = smov 128   ;;  %s142_s20 = smov 8  }
  0x12   :  { %21 = dma.hbm_to_vmem [thread:$0]  %s202_s0, 256, %s16_s10, [#allocation3], %s141_s19, %s141_s19, %s142_s20  }
  0x13   :  { %s143_s23 = smov [#allocation5]   ;;  %s90_s27 = scalar_lea.hbm %s203_s1, 128 }
  0x14   :  { %s28_s24 = sshll.u32 %s143_s23, 4  ;;  %p91_p8 = scmp.ne.s32.totalorder %s203_s1, %s90_s27  ;;  %s29_s24 = int_to_ptr.vmem [resolvable:$true] %s28_s24 }
  0x15   :  { %p94_p9 = scmp.lt.u32.totalorder %s90_s27, %s203_s1 }
  0x17   :  { %p96_p10 = pnand %p94_p9, %p91_p8 }
  0x19   :  { %99 = shalt.err (!%p96_p10)
}
  0x1a   :  { %s100_s4 = scalar_lea.vmem %s29_s24, 128  ;;  %p105_p12 = scmp.lt.s32.totalorder %s29_s24, %s29_s24 }
  0x1b   :  { %p101_p11 = scmp.ne.s32.totalorder %s29_s24, %s100_s4  ;;  %p106_p13 = scmp.lt.s32.totalorder %s100_s4, %s100_s4 }
  0x1d   :  { %p107_p0 = por %p106_p13, %p105_p12 }
  0x1f   :  { %p108_p1 = pnand %p107_p0, %p101_p11 }
  0x21   :  { %111 = shalt.err (!%p108_p1)
}
  0x22   :  { %31 = dma.hbm_to_vmem [thread:$0]  %s203_s1, 128, %s29_s24, [#allocation6]  }
  0x23   :  { %134 = dma.done.wait [#allocation3], 256  }
  0x24   :  { %135 = vsyncadd [#allocation3], 4294967040 }
  0x25   :  { %136 = dma.done.wait [#allocation6], 128  }
  0x26   :  { %137 = vsyncadd [#allocation6], 4294967168  ;;  %s144_s6 = smov [#allocation7]   ;;  %v38_v0 = vld [vmem:[#allocation2] sm:$0xff]  ;;  %v40_v1 = vld [vmem:[#allocation5] sm:$0xff] }
  0x27   :  { %s50_s7 = sshll.u32 %s144_s6, 4  ;;  %v39_v2 = vld [vmem:[#allocation2 + $0x8] sm:$0xff]  ;;  %v41_v3 = vadd.f32 %v40_v1, %v38_v0  ;;  %s51_s7 = int_to_ptr.vmem [resolvable:$true] %s50_s7 }
  0x28   :  { %v42_v4 = vadd.f32 %v40_v1, %v39_v2  ;;  %s112_s8 = scalar_lea.vmem %s51_s7, 256  ;;  %p117_p3 = scmp.lt.s32.totalorder %s51_s7, %s51_s7 }
  0x29   :  { %43 = vst [vmem:[#allocation7] sm:$0xff] %v41_v3  ;;  %p113_p2 = scmp.ne.s32.totalorder %s51_s7, %s112_s8  ;;  %p118_p4 = scmp.lt.s32.totalorder %s112_s8, %s112_s8 }
  0x2a   :  { %44 = vst [vmem:[#allocation7 + $0x8] sm:$0xff] %v42_v4 }
  0x2b   :  { %p119_p5 = por %p118_p4, %p117_p3 }
  0x2d   :  { %p120_p6 = pnand %p119_p5, %p113_p2 }
  0x2f   :  { %123 = shalt.err (!%p120_p6)
}
  0x30   :  { %s124_s10 = scalar_lea.hbm %s204_s2, 256 }
  0x31   :  { %p125_p7 = scmp.ne.s32.totalorder %s204_s2, %s124_s10  ;;  %p128_p8 = scmp.lt.u32.totalorder %s124_s10, %s204_s2 }
  0x33   :  { %p130_p9 = pnand %p128_p8, %p125_p7 }
  0x35   :  { %133 = shalt.err (!%p130_p9)
}
  0x36   :  { %56 = dma.vmem_to_hbm [thread:$0]  %s51_s7, 256, %s204_s2, [#allocation4], %s141_s19, %s141_s19, %s142_s20  }
  0x37   :  { %138 = dma.done.wait [#allocation4], 256  }
  0x38   :  { %139 = vsyncadd [#allocation4], 4294967040 }
  0x39   :  { %60 = vsyncpa [#allocation3], 1 }
  0x3a   :  { %61 = vsyncpa [#allocation6], 1 }
  0x3b   :  { %62 = vsyncpa [#allocation4], 1 }

</bundles_post_ra>
